<compile_context>
chip_gen: v7x
topology: tpu7x:2x2x1
jax: 0.10.0
libtpu: 0.0.40
codegen_flags: <defaults>
</compile_context>

<pallas_src>
import numpy as np

import jax
import jax.numpy as jnp
from jax import lax
from jax.experimental import pallas as pl
from jax.experimental.pallas import tpu as pltpu

EPS = 1e-5


def _band_3x3(w, W):
    """OIHW 3x3 conv weights -> (3*W*Cin, W*Cout) banded im2col matrix.

    Row block ky holds the taps applied to input image row (h + ky - 1); within
    a block rows are indexed (w_in*Cin + ci) and columns (w_out*Cout + co).
    The dx = kx-1 shifts and the width-direction zero padding are encoded as
    off-diagonal identity blocks, so the kernel needs no padding in W.
    """
    Cout, Cin = int(w.shape[0]), int(w.shape[1])
    blocks = []
    for ky in range(3):
        b = jnp.zeros((W * Cin, W * Cout), jnp.float32)
        for kx in range(3):
            # shift[w_in, w_out] = 1 iff w_in == w_out + kx - 1
            shift = np.eye(W, k=1 - kx, dtype=np.float32)
            b = b + jnp.kron(shift, jnp.transpose(w[:, :, ky, kx]))
        blocks.append(b)
    return jnp.concatenate(blocks, axis=0)


def prepare_block_params(params, W):
    """One-time (per weight set) preprocessing, hoisted out of the forward jit.

    Returns:
      rhs1_fused: (3*W*Cin, 2*W*Cout) bf16 — banded conv1 weights with the 1x1
                  shortcut fused in as extra output columns (center band only).
      rhs2:       (3*W*Cout, W*Cout)  bf16 — banded conv2 weights.
      bn_rows:    (8, W*Cout) f32 — rows 0..5 = g1,b1,g2,b2,gs,bs tiled to the
                  (w*Cout + c) lane layout; rows 6..7 are padding.
    """
    w1, g1, b1, w2, g2, b2, ws, gs, bs = params
    Cout, Cin = int(w1.shape[0]), int(w1.shape[1])
    WCin, WCout = W * Cin, W * Cout

    rhs1 = _band_3x3(w1, W)                                     # (3*WCin, WCout)
    rhs2 = _band_3x3(w2, W)                                     # (3*WCout, WCout)
    sc_band = jnp.kron(np.eye(W, dtype=np.float32),
                       jnp.transpose(ws.reshape(Cout, Cin)))    # (WCin, WCout)
    zblk = jnp.zeros((WCin, WCout), jnp.float32)
    rhs1_fused = jnp.concatenate(
        [rhs1, jnp.concatenate([zblk, sc_band, zblk], axis=0)], axis=1)

    def lanes(v):   # (C,) -> (W*C,) in lane layout (w*C + c)
        return jnp.tile(v.astype(jnp.float32), W)

    bn_rows = jnp.zeros((8, WCout), jnp.float32)
    for i, v in enumerate((g1, b1, g2, b2, gs, bs)):
        bn_rows = bn_rows.at[i].set(lanes(v))

    return (rhs1_fused.astype(jnp.bfloat16),
            rhs2.astype(jnp.bfloat16),
            bn_rows)


def _make_kernel(N, H, W, Cin, Cout):
    NH = N * H
    WCin = W * Cin
    WCout = W * Cout
    inv_cnt = 1.0 / float(N * H * W)
    pow2_w = (W & (W - 1)) == 0

    def shifted_rows(a3, L):
        # a3: (N, H, L) f32 -> the three row-shifted views (row h-1 / h / h+1),
        # each (N*H, L), with zero rows at each image's top/bottom (3x3 height
        # halo).  No 3L-wide concatenation is ever materialized.
        z = jnp.zeros((N, 1, L), jnp.float32)
        up = jnp.concatenate([z, a3[:, :H - 1, :]], axis=1).reshape(NH, L)
        mid = a3.reshape(NH, L)
        dn = jnp.concatenate([a3[:, 1:, :], z], axis=1).reshape(NH, L)
        return up, mid, dn

    def conv3x3(a3, rhs_ref, L):
        # Three K-block dots against the banded RHS row-blocks; bf16 operands,
        # f32 accumulation on the MXU.
        up, mid, dn = shifted_rows(a3, L)
        y = jnp.dot(up.astype(jnp.bfloat16), rhs_ref[0:L, :],
                    preferred_element_type=jnp.float32)
        y = y + jnp.dot(mid.astype(jnp.bfloat16), rhs_ref[L:2 * L, :],
                        preferred_element_type=jnp.float32)
        y = y + jnp.dot(dn.astype(jnp.bfloat16), rhs_ref[2 * L:3 * L, :],
                        preferred_element_type=jnp.float32)
        return y

    def batchnorm(y, g_l, b_l):
        # y: (N*H, W*Cout) f32; training-mode BN (biased variance).  Channel c
        # lives on lanes {w*Cout + c}; per-channel totals come from a log2(W)
        # doubling tree of circular lane rolls (XLU slot), staying lane-dense.
        stats = jnp.concatenate(
            [jnp.sum(y, axis=0, keepdims=True),
             jnp.sum(y * y, axis=0, keepdims=True)], axis=0)    # (2, W*Cout)
        tot = stats
        if pow2_w:
            s = Cout
            while s < WCout:                  # log2(W) roll+add steps
                tot = tot + pltpu.roll(tot, s, axis=1)
                s *= 2
        else:                                 # fallback: linear chain
            for k in range(1, W):
                tot = tot + pltpu.roll(stats, k * Cout, axis=1)
        mean = tot[0:1, :] * inv_cnt
        var = tot[1:2, :] * inv_cnt - mean * mean
        scale = g_l * lax.rsqrt(var + EPS)
        return y * scale + (b_l - mean * scale)

    def kernel(x_ref, rhs1_ref, rhs2_ref, bn_ref, o_ref):
        # x_ref   : (N, H, W*Cin) f32   channels-last rows (W*Cin = 64 here:
        #           half a vreg in lanes; acceptable at Cin=4 — see review).
        # rhs1_ref: (3*W*Cin, 2*W*Cout) bf16   [conv1 | 1x1 shortcut] bands
        # rhs2_ref: (3*W*Cout, W*Cout)  bf16   conv2 bands
        # bn_ref  : (8, W*Cout) f32     rows 0..5 = g1,b1,g2,b2,gs,bs
        # o_ref   : (N, H, W*Cout) f32  lane-dense output (last dim = 128)
        y1 = conv3x3(x_ref[...], rhs1_ref, WCin)                # (NH, 2*WCout)
        out1 = jnp.maximum(
            batchnorm(y1[:, :WCout], bn_ref[0:1, :], bn_ref[1:2, :]), 0.0)
        sc = batchnorm(y1[:, WCout:], bn_ref[4:5, :], bn_ref[5:6, :])

        y2 = conv3x3(out1.reshape(N, H, WCout), rhs2_ref, WCout)
        out2 = batchnorm(y2, bn_ref[2:3, :], bn_ref[3:4, :])

        o_ref[...] = jnp.maximum(out2 + sc, 0.0).reshape(N, H, WCout)

    return kernel


def basic_block(x_nchw, prepped):
    """PyTorch BasicBlock forward (stride=1, 1x1-conv shortcut), NCHW in/out.

    `prepped` comes from prepare_block_params() (built once per weight set).
    """
    rhs1_fused, rhs2, bn_rows = prepped
    N, Cin, H, W = x_nchw.shape
    WCout = bn_rows.shape[1]
    Cout = WCout // W

    # glue: NCHW -> lane-dense channels-last rows (N, H, W*Cin).  No padding.
    x_rows = jnp.transpose(x_nchw, (0, 2, 3, 1)).astype(jnp.float32)
    x_rows = x_rows.reshape(N, H, W * Cin)

    vmem = pl.BlockSpec(memory_space=pltpu.MemorySpace.VMEM)
    out_rows = pl.pallas_call(
        _make_kernel(N, H, W, Cin, Cout),
        out_shape=jax.ShapeDtypeStruct((N, H, WCout), jnp.float32),
        in_specs=[vmem] * 4,
        out_specs=vmem,
    )(x_rows, rhs1_fused, rhs2, bn_rows)

    return jnp.transpose(out_rows.reshape(N, H, W, Cout), (0, 3, 1, 2))


# ---------------- pure-JAX reference (for correctness check) ----------------
def _bn_ref(x, g, b):  # x: NCHW, training-mode batch norm
    mean = jnp.mean(x, axis=(0, 2, 3), keepdims=True)
    var = jnp.mean(jnp.square(x - mean), axis=(0, 2, 3), keepdims=True)
    return (x - mean) * lax.rsqrt(var + EPS) * g.reshape(1, -1, 1, 1) \
           + b.reshape(1, -1, 1, 1)


def _conv_ref(x, w, pad):
    return lax.conv_general_dilated(
        x, w, window_strides=(1, 1), padding=[(pad, pad), (pad, pad)],
        dimension_numbers=('NCHW', 'OIHW', 'NCHW'))


def basic_block_ref(x, params):
    w1, g1, b1, w2, g2, b2, ws, gs, bs = params
    out = jax.nn.relu(_bn_ref(_conv_ref(x, w1, 1), g1, b1))
    out = _bn_ref(_conv_ref(out, w2, 1), g2, b2)
    out = out + _bn_ref(_conv_ref(x, ws, 0), gs, bs)
    return jax.nn.relu(out)


if __name__ == "__main__":
    N, Cin, Cout, H, W = 2, 4, 8, 16, 16        # in_planes=4, planes=8, stride=1
    key = jax.random.PRNGKey(0)
    ks = jax.random.split(key, 10)

    x = jax.random.normal(ks[0], (N, Cin, H, W), jnp.float32)

    w1 = 0.2 * jax.random.normal(ks[1], (Cout, Cin, 3, 3), jnp.float32)
    g1 = 1.0 + 0.1 * jax.random.normal(ks[2], (Cout,), jnp.float32)
    b1 = 0.1 * jax.random.normal(ks[3], (Cout,), jnp.float32)
    w2 = 0.2 * jax.random.normal(ks[4], (Cout, Cout, 3, 3), jnp.float32)
    g2 = 1.0 + 0.1 * jax.random.normal(ks[5], (Cout,), jnp.float32)
    b2 = 0.1 * jax.random.normal(ks[6], (Cout,), jnp.float32)
    ws = 0.2 * jax.random.normal(ks[7], (Cout, Cin, 1, 1), jnp.float32)
    gs = 1.0 + 0.1 * jax.random.normal(ks[8], (Cout,), jnp.float32)
    bs = 0.1 * jax.random.normal(ks[9], (Cout,), jnp.float32)

    params = (w1, g1, b1, w2, g2, b2, ws, gs, bs)

    # One-time weight preprocessing (band matrices, bf16 cast, BN lane pack),
    # hoisted outside the per-forward jit.
    prepped = prepare_block_params(params, W)

    fwd = jax.jit(basic_block)
    out = jax.block_until_ready(fwd(x, prepped))
    ref = jax.block_until_ready(basic_block_ref(x, params))

    assert out.shape == (N, Cout, H, W)
    max_err = float(jnp.max(jnp.abs(out - ref)))
    mean_err = float(jnp.mean(jnp.abs(out - ref)))
    # bf16 MXU operands (f32 accumulation) through two convs + BN: worst-case
    # absolute error ~1e-2-scale on O(1..5) outputs; typical error much lower.
    assert max_err < 8e-2 and mean_err < 1e-2, (max_err, mean_err)
    print("KERNEL_OK")
</pallas_src>

<mosaic_0001>
module attributes {stable_mosaic.version = 11 : i64} {
  func.func @kernel(%arg0: memref<2x16x64xf32, #tpu.memory_space<vmem>>, %arg1: memref<192x256xbf16, #tpu.memory_space<vmem>>, %arg2: memref<384x128xbf16, #tpu.memory_space<vmem>>, %arg3: memref<8x128xf32, #tpu.memory_space<vmem>>, %arg4: memref<2x16x128xf32, #tpu.memory_space<vmem>>) attributes {dimension_semantics = [], scalar_prefetch = 0 : i64, scratch_operands = 0 : i64, tpu.core_type = #tpu.core_type<tc>} {
    %c0 = arith.constant 0 : index
    %c0_0 = arith.constant 0 : index
    %c0_1 = arith.constant 0 : index
    %0 = vector.load %arg0[%c0, %c0_0, %c0_1] : memref<2x16x64xf32, #tpu.memory_space<vmem>>, vector<2x16x64xf32>
    %cst = arith.constant 0.000000e+00 : f32
    %1 = vector.broadcast %cst : f32 to vector<2x1x64xf32>
    %2 = vector.extract_strided_slice %0 {offsets = [0, 0, 0], sizes = [2, 15, 64], strides = [1, 1, 1]} : vector<2x16x64xf32> to vector<2x15x64xf32>
    %3 = tpu.concatenate %1, %2 in 1 : vector<2x1x64xf32>, vector<2x15x64xf32> -> vector<2x16x64xf32>
    %4 = vector.shape_cast %3 : vector<2x16x64xf32> to vector<32x64xf32>
    %5 = vector.shape_cast %0 : vector<2x16x64xf32> to vector<32x64xf32>
    %6 = vector.extract_strided_slice %0 {offsets = [0, 1, 0], sizes = [2, 15, 64], strides = [1, 1, 1]} : vector<2x16x64xf32> to vector<2x15x64xf32>
    %7 = tpu.concatenate %6, %1 in 1 : vector<2x15x64xf32>, vector<2x1x64xf32> -> vector<2x16x64xf32>
    %8 = vector.shape_cast %7 : vector<2x16x64xf32> to vector<32x64xf32>
    %9 = arith.truncf %4 : vector<32x64xf32> to vector<32x64xbf16>
    %c0_2 = arith.constant 0 : index
    %c0_3 = arith.constant 0 : index
    %10 = vector.load %arg1[%c0_2, %c0_3] : memref<192x256xbf16, #tpu.memory_space<vmem>>, vector<64x256xbf16>
    %cst_4 = arith.constant dense<0.000000e+00> : vector<32x256xf32>
    %11 = tpu.matmul %9, %10, %cst_4 {dimension_numbers = #tpu.dot_dimension_numbers<[1], [0], [0], [1], [0, 0, 1, 1], [], []>} : vector<32x64xbf16>, vector<64x256xbf16>, vector<32x256xf32> -> vector<32x256xf32>
    %12 = arith.truncf %5 : vector<32x64xf32> to vector<32x64xbf16>
    %c64 = arith.constant 64 : index
    %c0_5 = arith.constant 0 : index
    %13 = vector.load %arg1[%c64, %c0_5] : memref<192x256xbf16, #tpu.memory_space<vmem>>, vector<64x256xbf16>
    %cst_6 = arith.constant dense<0.000000e+00> : vector<32x256xf32>
    %14 = tpu.matmul %12, %13, %cst_6 {dimension_numbers = #tpu.dot_dimension_numbers<[1], [0], [0], [1], [0, 0, 1, 1], [], []>} : vector<32x64xbf16>, vector<64x256xbf16>, vector<32x256xf32> -> vector<32x256xf32>
    %15 = arith.addf %11, %14 : vector<32x256xf32>
    %16 = arith.truncf %8 : vector<32x64xf32> to vector<32x64xbf16>
    %c128 = arith.constant 128 : index
    %c0_7 = arith.constant 0 : index
    %17 = vector.load %arg1[%c128, %c0_7] : memref<192x256xbf16, #tpu.memory_space<vmem>>, vector<64x256xbf16>
    %cst_8 = arith.constant dense<0.000000e+00> : vector<32x256xf32>
    %18 = tpu.matmul %16, %17, %cst_8 {dimension_numbers = #tpu.dot_dimension_numbers<[1], [0], [0], [1], [0, 0, 1, 1], [], []>} : vector<32x64xbf16>, vector<64x256xbf16>, vector<32x256xf32> -> vector<32x256xf32>
    %19 = arith.addf %15, %18 : vector<32x256xf32>
    %20 = vector.extract_strided_slice %19 {offsets = [0, 0], sizes = [32, 128], strides = [1, 1]} : vector<32x256xf32> to vector<32x128xf32>
    %c0_9 = arith.constant 0 : index
    %c0_10 = arith.constant 0 : index
    %21 = vector.load %arg3[%c0_9, %c0_10] : memref<8x128xf32, #tpu.memory_space<vmem>>, vector<1x128xf32>
    %c1 = arith.constant 1 : index
    %c0_11 = arith.constant 0 : index
    %22 = vector.load %arg3[%c1, %c0_11] : memref<8x128xf32, #tpu.memory_space<vmem>>, vector<1x128xf32>
    %cst_12 = arith.constant dense<0.000000e+00> : vector<128xf32>
    %23 = vector.multi_reduction <add>, %20, %cst_12 [0] : vector<32x128xf32> to vector<128xf32>
    %24 = vector.shape_cast %23 : vector<128xf32> to vector<1x128xf32>
    %25 = arith.mulf %20, %20 : vector<32x128xf32>
    %cst_13 = arith.constant dense<0.000000e+00> : vector<128xf32>
    %26 = vector.multi_reduction <add>, %25, %cst_13 [0] : vector<32x128xf32> to vector<128xf32>
    %27 = vector.shape_cast %26 : vector<128xf32> to vector<1x128xf32>
    %28 = tpu.concatenate %24, %27 in 0 : vector<1x128xf32>, vector<1x128xf32> -> vector<2x128xf32>
    %c8_i32 = arith.constant 8 : i32
    %29 = tpu.dynamic_rotate %28 by %c8_i32 dim 1 : vector<2x128xf32>, i32 -> vector<2x128xf32>
    %30 = arith.addf %28, %29 : vector<2x128xf32>
    %c16_i32 = arith.constant 16 : i32
    %31 = tpu.dynamic_rotate %30 by %c16_i32 dim 1 : vector<2x128xf32>, i32 -> vector<2x128xf32>
    %32 = arith.addf %30, %31 : vector<2x128xf32>
    %c32_i32 = arith.constant 32 : i32
    %33 = tpu.dynamic_rotate %32 by %c32_i32 dim 1 : vector<2x128xf32>, i32 -> vector<2x128xf32>
    %34 = arith.addf %32, %33 : vector<2x128xf32>
    %c64_i32 = arith.constant 64 : i32
    %35 = tpu.dynamic_rotate %34 by %c64_i32 dim 1 : vector<2x128xf32>, i32 -> vector<2x128xf32>
    %36 = arith.addf %34, %35 : vector<2x128xf32>
    %37 = vector.extract_strided_slice %36 {offsets = [0, 0], sizes = [1, 128], strides = [1, 1]} : vector<2x128xf32> to vector<1x128xf32>
    %cst_14 = arith.constant 0.001953125 : f32
    %38 = vector.broadcast %cst_14 : f32 to vector<1x128xf32>
    %39 = arith.mulf %37, %38 : vector<1x128xf32>
    %40 = vector.extract_strided_slice %36 {offsets = [1, 0], sizes = [1, 128], strides = [1, 1]} : vector<2x128xf32> to vector<1x128xf32>
    %cst_15 = arith.constant 0.001953125 : f32
    %41 = vector.broadcast %cst_15 : f32 to vector<1x128xf32>
    %42 = arith.mulf %40, %41 : vector<1x128xf32>
    %43 = arith.mulf %39, %39 : vector<1x128xf32>
    %44 = arith.subf %42, %43 : vector<1x128xf32>
    %cst_16 = arith.constant 9.99999974E-6 : f32
    %45 = vector.broadcast %cst_16 : f32 to vector<1x128xf32>
    %46 = arith.addf %44, %45 : vector<1x128xf32>
    %47 = math.rsqrt %46 : vector<1x128xf32>
    %48 = arith.mulf %21, %47 : vector<1x128xf32>
    %49 = vector.broadcast %48 : vector<1x128xf32> to vector<32x128xf32>
    %50 = arith.mulf %20, %49 : vector<32x128xf32>
    %51 = arith.mulf %39, %48 : vector<1x128xf32>
    %52 = arith.subf %22, %51 : vector<1x128xf32>
    %53 = vector.broadcast %52 : vector<1x128xf32> to vector<32x128xf32>
    %54 = arith.addf %50, %53 : vector<32x128xf32>
    %cst_17 = arith.constant 0.000000e+00 : f32
    %55 = vector.broadcast %cst_17 : f32 to vector<32x128xf32>
    %56 = arith.maximumf %54, %55 : vector<32x128xf32>
    %57 = vector.extract_strided_slice %19 {offsets = [0, 128], sizes = [32, 128], strides = [1, 1]} : vector<32x256xf32> to vector<32x128xf32>
    %c4 = arith.constant 4 : index
    %c0_18 = arith.constant 0 : index
    %58 = vector.load %arg3[%c4, %c0_18] : memref<8x128xf32, #tpu.memory_space<vmem>>, vector<1x128xf32>
    %c5 = arith.constant 5 : index
    %c0_19 = arith.constant 0 : index
    %59 = vector.load %arg3[%c5, %c0_19] : memref<8x128xf32, #tpu.memory_space<vmem>>, vector<1x128xf32>
    %cst_20 = arith.constant dense<0.000000e+00> : vector<128xf32>
    %60 = vector.multi_reduction <add>, %57, %cst_20 [0] : vector<32x128xf32> to vector<128xf32>
    %61 = vector.shape_cast %60 : vector<128xf32> to vector<1x128xf32>
    %62 = arith.mulf %57, %57 : vector<32x128xf32>
    %cst_21 = arith.constant dense<0.000000e+00> : vector<128xf32>
    %63 = vector.multi_reduction <add>, %62, %cst_21 [0] : vector<32x128xf32> to vector<128xf32>
    %64 = vector.shape_cast %63 : vector<128xf32> to vector<1x128xf32>
    %65 = tpu.concatenate %61, %64 in 0 : vector<1x128xf32>, vector<1x128xf32> -> vector<2x128xf32>
    %c8_i32_22 = arith.constant 8 : i32
    %66 = tpu.dynamic_rotate %65 by %c8_i32_22 dim 1 : vector<2x128xf32>, i32 -> vector<2x128xf32>
    %67 = arith.addf %65, %66 : vector<2x128xf32>
    %c16_i32_23 = arith.constant 16 : i32
    %68 = tpu.dynamic_rotate %67 by %c16_i32_23 dim 1 : vector<2x128xf32>, i32 -> vector<2x128xf32>
    %69 = arith.addf %67, %68 : vector<2x128xf32>
    %c32_i32_24 = arith.constant 32 : i32
    %70 = tpu.dynamic_rotate %69 by %c32_i32_24 dim 1 : vector<2x128xf32>, i32 -> vector<2x128xf32>
    %71 = arith.addf %69, %70 : vector<2x128xf32>
    %c64_i32_25 = arith.constant 64 : i32
    %72 = tpu.dynamic_rotate %71 by %c64_i32_25 dim 1 : vector<2x128xf32>, i32 -> vector<2x128xf32>
    %73 = arith.addf %71, %72 : vector<2x128xf32>
    %74 = vector.extract_strided_slice %73 {offsets = [0, 0], sizes = [1, 128], strides = [1, 1]} : vector<2x128xf32> to vector<1x128xf32>
    %cst_26 = arith.constant 0.001953125 : f32
    %75 = vector.broadcast %cst_26 : f32 to vector<1x128xf32>
    %76 = arith.mulf %74, %75 : vector<1x128xf32>
    %77 = vector.extract_strided_slice %73 {offsets = [1, 0], sizes = [1, 128], strides = [1, 1]} : vector<2x128xf32> to vector<1x128xf32>
    %cst_27 = arith.constant 0.001953125 : f32
    %78 = vector.broadcast %cst_27 : f32 to vector<1x128xf32>
    %79 = arith.mulf %77, %78 : vector<1x128xf32>
    %80 = arith.mulf %76, %76 : vector<1x128xf32>
    %81 = arith.subf %79, %80 : vector<1x128xf32>
    %cst_28 = arith.constant 9.99999974E-6 : f32
    %82 = vector.broadcast %cst_28 : f32 to vector<1x128xf32>
    %83 = arith.addf %81, %82 : vector<1x128xf32>
    %84 = math.rsqrt %83 : vector<1x128xf32>
    %85 = arith.mulf %58, %84 : vector<1x128xf32>
    %86 = vector.broadcast %85 : vector<1x128xf32> to vector<32x128xf32>
    %87 = arith.mulf %57, %86 : vector<32x128xf32>
    %88 = arith.mulf %76, %85 : vector<1x128xf32>
    %89 = arith.subf %59, %88 : vector<1x128xf32>
    %90 = vector.broadcast %89 : vector<1x128xf32> to vector<32x128xf32>
    %91 = arith.addf %87, %90 : vector<32x128xf32>
    %92 = vector.shape_cast %56 : vector<32x128xf32> to vector<2x16x128xf32>
    %cst_29 = arith.constant 0.000000e+00 : f32
    %93 = vector.broadcast %cst_29 : f32 to vector<2x1x128xf32>
    %94 = vector.extract_strided_slice %92 {offsets = [0, 0, 0], sizes = [2, 15, 128], strides = [1, 1, 1]} : vector<2x16x128xf32> to vector<2x15x128xf32>
    %95 = tpu.concatenate %93, %94 in 1 : vector<2x1x128xf32>, vector<2x15x128xf32> -> vector<2x16x128xf32>
    %96 = vector.shape_cast %95 : vector<2x16x128xf32> to vector<32x128xf32>
    %97 = vector.shape_cast %92 : vector<2x16x128xf32> to vector<32x128xf32>
    %98 = vector.extract_strided_slice %92 {offsets = [0, 1, 0], sizes = [2, 15, 128], strides = [1, 1, 1]} : vector<2x16x128xf32> to vector<2x15x128xf32>
    %99 = tpu.concatenate %98, %93 in 1 : vector<2x15x128xf32>, vector<2x1x128xf32> -> vector<2x16x128xf32>
    %100 = vector.shape_cast %99 : vector<2x16x128xf32> to vector<32x128xf32>
    %101 = arith.truncf %96 : vector<32x128xf32> to vector<32x128xbf16>
    %c0_30 = arith.constant 0 : index
    %c0_31 = arith.constant 0 : index
    %102 = vector.load %arg2[%c0_30, %c0_31] : memref<384x128xbf16, #tpu.memory_space<vmem>>, vector<128x128xbf16>
    %cst_32 = arith.constant dense<0.000000e+00> : vector<32x128xf32>
    %103 = tpu.matmul %101, %102, %cst_32 {dimension_numbers = #tpu.dot_dimension_numbers<[1], [0], [0], [1], [0, 0, 1, 1], [], []>} : vector<32x128xbf16>, vector<128x128xbf16>, vector<32x128xf32> -> vector<32x128xf32>
    %104 = arith.truncf %97 : vector<32x128xf32> to vector<32x128xbf16>
    %c128_33 = arith.constant 128 : index
    %c0_34 = arith.constant 0 : index
    %105 = vector.load %arg2[%c128_33, %c0_34] : memref<384x128xbf16, #tpu.memory_space<vmem>>, vector<128x128xbf16>
    %cst_35 = arith.constant dense<0.000000e+00> : vector<32x128xf32>
    %106 = tpu.matmul %104, %105, %cst_35 {dimension_numbers = #tpu.dot_dimension_numbers<[1], [0], [0], [1], [0, 0, 1, 1], [], []>} : vector<32x128xbf16>, vector<128x128xbf16>, vector<32x128xf32> -> vector<32x128xf32>
    %107 = arith.addf %103, %106 : vector<32x128xf32>
    %108 = arith.truncf %100 : vector<32x128xf32> to vector<32x128xbf16>
    %c256 = arith.constant 256 : index
    %c0_36 = arith.constant 0 : index
    %109 = vector.load %arg2[%c256, %c0_36] : memref<384x128xbf16, #tpu.memory_space<vmem>>, vector<128x128xbf16>
    %cst_37 = arith.constant dense<0.000000e+00> : vector<32x128xf32>
    %110 = tpu.matmul %108, %109, %cst_37 {dimension_numbers = #tpu.dot_dimension_numbers<[1], [0], [0], [1], [0, 0, 1, 1], [], []>} : vector<32x128xbf16>, vector<128x128xbf16>, vector<32x128xf32> -> vector<32x128xf32>
    %111 = arith.addf %107, %110 : vector<32x128xf32>
    %c2 = arith.constant 2 : index
    %c0_38 = arith.constant 0 : index
    %112 = vector.load %arg3[%c2, %c0_38] : memref<8x128xf32, #tpu.memory_space<vmem>>, vector<1x128xf32>
    %c3 = arith.constant 3 : index
    %c0_39 = arith.constant 0 : index
    %113 = vector.load %arg3[%c3, %c0_39] : memref<8x128xf32, #tpu.memory_space<vmem>>, vector<1x128xf32>
    %cst_40 = arith.constant dense<0.000000e+00> : vector<128xf32>
    %114 = vector.multi_reduction <add>, %111, %cst_40 [0] : vector<32x128xf32> to vector<128xf32>
    %115 = vector.shape_cast %114 : vector<128xf32> to vector<1x128xf32>
    %116 = arith.mulf %111, %111 : vector<32x128xf32>
    %cst_41 = arith.constant dense<0.000000e+00> : vector<128xf32>
    %117 = vector.multi_reduction <add>, %116, %cst_41 [0] : vector<32x128xf32> to vector<128xf32>
    %118 = vector.shape_cast %117 : vector<128xf32> to vector<1x128xf32>
    %119 = tpu.concatenate %115, %118 in 0 : vector<1x128xf32>, vector<1x128xf32> -> vector<2x128xf32>
    %c8_i32_42 = arith.constant 8 : i32
    %120 = tpu.dynamic_rotate %119 by %c8_i32_42 dim 1 : vector<2x128xf32>, i32 -> vector<2x128xf32>
    %121 = arith.addf %119, %120 : vector<2x128xf32>
    %c16_i32_43 = arith.constant 16 : i32
    %122 = tpu.dynamic_rotate %121 by %c16_i32_43 dim 1 : vector<2x128xf32>, i32 -> vector<2x128xf32>
    %123 = arith.addf %121, %122 : vector<2x128xf32>
    %c32_i32_44 = arith.constant 32 : i32
    %124 = tpu.dynamic_rotate %123 by %c32_i32_44 dim 1 : vector<2x128xf32>, i32 -> vector<2x128xf32>
    %125 = arith.addf %123, %124 : vector<2x128xf32>
    %c64_i32_45 = arith.constant 64 : i32
    %126 = tpu.dynamic_rotate %125 by %c64_i32_45 dim 1 : vector<2x128xf32>, i32 -> vector<2x128xf32>
    %127 = arith.addf %125, %126 : vector<2x128xf32>
    %128 = vector.extract_strided_slice %127 {offsets = [0, 0], sizes = [1, 128], strides = [1, 1]} : vector<2x128xf32> to vector<1x128xf32>
    %cst_46 = arith.constant 0.001953125 : f32
    %129 = vector.broadcast %cst_46 : f32 to vector<1x128xf32>
    %130 = arith.mulf %128, %129 : vector<1x128xf32>
    %131 = vector.extract_strided_slice %127 {offsets = [1, 0], sizes = [1, 128], strides = [1, 1]} : vector<2x128xf32> to vector<1x128xf32>
    %cst_47 = arith.constant 0.001953125 : f32
    %132 = vector.broadcast %cst_47 : f32 to vector<1x128xf32>
    %133 = arith.mulf %131, %132 : vector<1x128xf32>
    %134 = arith.mulf %130, %130 : vector<1x128xf32>
    %135 = arith.subf %133, %134 : vector<1x128xf32>
    %cst_48 = arith.constant 9.99999974E-6 : f32
    %136 = vector.broadcast %cst_48 : f32 to vector<1x128xf32>
    %137 = arith.addf %135, %136 : vector<1x128xf32>
    %138 = math.rsqrt %137 : vector<1x128xf32>
    %139 = arith.mulf %112, %138 : vector<1x128xf32>
    %140 = vector.broadcast %139 : vector<1x128xf32> to vector<32x128xf32>
    %141 = arith.mulf %111, %140 : vector<32x128xf32>
    %142 = arith.mulf %130, %139 : vector<1x128xf32>
    %143 = arith.subf %113, %142 : vector<1x128xf32>
    %144 = vector.broadcast %143 : vector<1x128xf32> to vector<32x128xf32>
    %145 = arith.addf %141, %144 : vector<32x128xf32>
    %146 = arith.addf %145, %91 : vector<32x128xf32>
    %cst_49 = arith.constant 0.000000e+00 : f32
    %147 = vector.broadcast %cst_49 : f32 to vector<32x128xf32>
    %148 = arith.maximumf %146, %147 : vector<32x128xf32>
    %149 = vector.shape_cast %148 : vector<32x128xf32> to vector<2x16x128xf32>
    %c0_50 = arith.constant 0 : index
    %c0_51 = arith.constant 0 : index
    %c0_52 = arith.constant 0 : index
    %150 = vector.load %arg4[%c0_50, %c0_51, %c0_52] : memref<2x16x128xf32, #tpu.memory_space<vmem>>, vector<2x16x128xf32>
    tpu.vector_store %arg4[%c0_50, %c0_51, %c0_52], %149 {strides = array<i32>} : memref<2x16x128xf32, #tpu.memory_space<vmem>>, vector<2x16x128xf32>,
    return
  }
}

</mosaic_0001>

<bundles_post_ra>
// kernel: basic_block.1
= control target key start
LH: loop header
LB: loop body
LE: loop exit
PB: predicated region body
PF: predicated region fallthrough
CT: control target
= control target key end

     0   :  { %v1240_v1 = vmov 0   ;;  %vm112_vm0 = vcmask 523264   ;;  %vm26_vm1 = vcmask 1040384   ;;  %vm39_vm2 = vcmask 1046528   ;;  %s1242_s18 = smov 16   ;;  %s1243_s19 = smov 32   ;;  %s1594_s1 = inlined_call_operand.vmem [shape: bf16[192,256], index: 1, kind: input, shape index: {}]   ;;  %s1595_s0 = inlined_call_operand.vmem [shape: f32[2,16,64], index: 0, kind: input, shape index: {}]   ;;  %s1596_s2 = inlined_call_operand.vmem [shape: bf16[384,128], index: 2, kind: input, shape index: {}]   ;;  %s1597_s3 = inlined_call_operand.vmem [shape: f32[8,128], index: 3, kind: input, shape index: {}]   ;;  %s1598_s4 = inlined_call_operand.vmem [shape: f32[2,16,128], index: 4, kind: output, shape index: {}]  }
   0x1   :  { %v1174_v0 = vld [vmem:[%s1594_s1 + $0x44] ss:$8 sps:$4 sm:$0xff]   ;;  %151 = vmatprep.mubr.bf16.mxu0 %v1240_v1  ;;  %v1176_v2 = vld [vmem:[%s1594_s1 + $0x40] ss:$8 sps:$4 sm:$0xff]   ;;  %v1177_v3 = vld [vmem:[%s1594_s1 + $0x54] ss:$8 sps:$4 sm:$0xff]  }
   0x2   :  { %119 = vmatprep.subr.bf16.mxu0 %v1174_v0  ;;  %v1179_v4 = vld [vmem:[%s1594_s1 + $0x50] ss:$8 sps:$4 sm:$0xff]   ;;  %v1180_v5 = vld [vmem:[%s1594_s1 + $0x64] ss:$8 sps:$4 sm:$0xff]   ;;  %v1182_v6 = vld [vmem:[%s1594_s1 + $0x60] ss:$8 sps:$4 sm:$0xff]  }
   0x3   :  { %120 = vmatpush1.bf16.msra.mxu0 %v1176_v2  ;;  %v1183_v7 = vld [vmem:[%s1594_s1 + $0x74] ss:$8 sps:$4 sm:$0xff]   ;;  %v1185_v8 = vld [vmem:[%s1594_s1 + $0x70] ss:$8 sps:$4 sm:$0xff]   ;;  %v18_v9 = vld [vmem:[%s1595_s0] sm:$0xff]  ;;  %s1244_s27 = smov 64  }
   0x4   :  { %121 = vmatprep.subr.bf16.mxu0 %v1177_v3  ;;  %v19_v10 = vld [vmem:[%s1595_s0 + $0x8] sm:$0xff]  ;;  %v1191_v14 = vld [vmem:[%s1594_s1 + $0x14] ss:$8 sps:$4 sm:$0xff]   ;;  %v1189_v15 = vld [vmem:[%s1594_s1 + $0x10] ss:$8 sps:$4 sm:$0xff]   ;;  %v27_v20 = vrot.slane %v18_v9, 7 }
   0x5   :  { %v1188_v11 = vld [vmem:[%s1594_s1 + $0x4] ss:$8 sps:$4 sm:$0xff]   ;;  %v62_v12 = vpack.c.bf16 %v19_v10, %v18_v9  ;;  %v1186_v13 = vld [vmem:[%s1594_s1] ss:$8 sps:$4 sm:$0xff]   ;;  %v20_v16 = vld [vmem:[%s1595_s0 + $0x10] sm:$0xff]  ;;  %v28_v21 = vrot.slane %v19_v10, 7 }
   0x6   :  { %v21_v17 = vld [vmem:[%s1595_s0 + $0x18] sm:$0xff]  ;;  %v1194_v18 = vld [vmem:[%s1594_s1 + $0x24] ss:$8 sps:$4 sm:$0xff]   ;;  %v1192_v22 = vld [vmem:[%s1594_s1 + $0x20] ss:$8 sps:$4 sm:$0xff]   ;;  %v37_v25 = vsel %vm26_vm1, 0.0, %v27_v20 }
   0x7   :  { %122 = vmatpush1.bf16.msra.mxu0 %v1179_v4  ;;  %v63_v19 = vpack.c.bf16 %v21_v17, %v20_v16  ;;  %v1197_v23 = vld [vmem:[%s1594_s1 + $0x34] ss:$8 sps:$4 sm:$0xff]   ;;  %v29_v24 = vsel %vm26_vm1, %v27_v20, %v28_v21  ;;  %v1195_v26 = vld [vmem:[%s1594_s1 + $0x30] ss:$8 sps:$4 sm:$0xff]   ;;  %v1200_v27 = vld [vmem:[%s1594_s1 + $0x84] ss:$8 sps:$4 sm:$0xff]  }
   0x8   :  { %123 = vmatprep.subr.bf16.mxu0 %v1180_v5  ;;  %v52_v28 = vpack.c.bf16 %v29_v24, %v37_v25  ;;  %v31_v29 = vrot.slane %v21_v17, 7  ;;  %v1198_v30 = vld [vmem:[%s1594_s1 + $0x80] ss:$8 sps:$4 sm:$0xff]   ;;  %v30_v31 = vrot.slane %v20_v16, 7  ;;  %v1203_v32 = vld [vmem:[%s1594_s1 + $0x94] ss:$8 sps:$4 sm:$0xff]   ;;  %vm1032_vm3 = vmneg %vm26_vm1 }
   0x9   :  { %v1201_v33 = vld [vmem:[%s1594_s1 + $0x90] ss:$8 sps:$4 sm:$0xff]   ;;  %v1206_v36 = vld [vmem:[%s1594_s1 + $0xa4] ss:$8 sps:$4 sm:$0xff]   ;;  %v40_v38 = vrot.slane %v18_v9, 1  ;;  %v41_v39 = vrot.slane %v19_v10, 1 }
   0xa   :  { %v32_v34 = vsel %vm26_vm1, %v30_v31, %v31_v29  ;;  %v38_v35 = vsel %vm26_vm1, 0.0, %v30_v31  ;;  %v1204_v40 = vld [vmem:[%s1594_s1 + $0xa0] ss:$8 sps:$4 sm:$0xff]   ;;  %v1209_v41 = vld [vmem:[%s1594_s1 + $0xb4] ss:$8 sps:$4 sm:$0xff]   ;;  %v43_v46 = vrot.slane %v20_v16, 1 }
   0xb   :  { %124 = vmatpush1.bf16.msra.mxu0 %v1182_v6  ;;  %v53_v37 = vpack.c.bf16 %v32_v34, %v38_v35  ;;  %v42_v42 = vsel %vm39_vm2, %v40_v38, %v41_v39  ;;  %v50_v43 = vsel %vm39_vm2, %v41_v39, 0.0  ;;  %v1207_v44 = vld [vmem:[%s1594_s1 + $0xb0] ss:$8 sps:$4 sm:$0xff]   ;;  %v44_v47 = vrot.slane %v21_v17, 1  ;;  %s1241_s1 = smov 8  }
   0xc   :  { %125 = vmatprep.subr.bf16.mxu0 %v1183_v7  ;;  %v271_v45 = vpack.c.bf16 %v50_v43, %v42_v42  ;;  %vm1245_vm4 = vmmov 1  }
   0xd   :  { %v45_v48 = vsel %vm39_vm2, %v43_v46, %v44_v47  ;;  %v51_v49 = vsel %vm39_vm2, %v44_v47, 0.0  ;;  %v1210_v47 = vld [vmem:[%s1596_s2 + $0x40] sm:$0xff]   ;;  %vm1033_vm5 = vmpackc.low %vm1245_vm4, %vm1032_vm3 }
   0xe   :  { %v272_v50 = vpack.c.bf16 %v51_v49, %v45_v48  ;;  %v1211_v48 = vld [vmem:[%s1596_s2] sm:$0xff]   ;;  %vm1501_vm6 = vmpackc.low %vm39_vm2, %vm1245_vm4 }
   0xf   :  { %126 = vmatpush1.bf16.msra.mxu0 %v1185_v8  ;;  %1104 = vmatprep.subr.bf16.mxu1 %v1211_v48 }
  0x10   :  { %218 = vmatprep.subr.bf16.mxu0 %v1188_v11  ;;  %1105 = vmatpush3.bf16.msra.mxu1 %v1211_v48 }
  0x12   :  { %994 = vmatmul.mubr.msk.bf16.vlgmr.msra.gmra.mrb[0].mxu0 %vm112_vm0, %v62_v12 }
  0x13   :  { %219 = vmatpush1.bf16.msra.mxu0 %v1186_v13  ;;  %161 = vmatprep.mubr.bf16.mxu0 %v1240_v1 }
  0x14   :  { %220 = vmatprep.subr.bf16.mxu0 %v1191_v14 }
  0x17   :  { %221 = vmatpush1.bf16.msra.mxu0 %v1189_v15 }
  0x18   :  { %222 = vmatprep.subr.bf16.mxu0 %v1194_v18 }
  0x1a   :  { %995 = vmatmul.mubr.msk.bf16.gmra.mrb[4].mxu0 %vm112_vm0, %v63_v19 }
  0x1b   :  { %223 = vmatpush1.bf16.msra.mxu0 %v1192_v22  ;;  %250 = vmatprep.mubr.bf16.mxu0 %v1240_v1 }
  0x1c   :  { %224 = vmatprep.subr.bf16.mxu0 %v1197_v23 }
  0x1f   :  { %225 = vmatpush1.bf16.msra.mxu0 %v1195_v26 }
  0x20   :  { %327 = vmatprep.subr.bf16.mxu0 %v1200_v27 }
  0x22   :  { %1004 = vmatmul.mubr.msk.bf16.vlgmr.msra.gmra.mrb[0].mxu0 %vm112_vm0, %v52_v28 }
  0x23   :  { %328 = vmatpush1.bf16.msra.mxu0 %v1198_v30  ;;  %260 = vmatprep.mubr.bf16.mxu0 %v1240_v1 }
  0x24   :  { %329 = vmatprep.subr.bf16.mxu0 %v1203_v32 }
  0x27   :  { %330 = vmatpush1.bf16.msra.mxu0 %v1201_v33 }
  0x28   :  { %331 = vmatprep.subr.bf16.mxu0 %v1206_v36 }
  0x2a   :  { %1005 = vmatmul.mubr.msk.bf16.gmra.mrb[4].mxu0 %vm112_vm0, %v53_v37 }
  0x2b   :  { %332 = vmatpush1.bf16.msra.mxu0 %v1204_v40  ;;  %359 = vmatprep.mubr.bf16.mxu0 %v1240_v1 }
  0x2c   :  { %333 = vmatprep.subr.bf16.mxu0 %v1209_v41 }
  0x2f   :  { %334 = vmatpush1.bf16.msra.mxu0 %v1207_v44 }
  0x30   :  { %1084 = vmatprep.subr.bf16.mxu0 %v1210_v47 }
  0x32   :  { %1014 = vmatmul.mubr.msk.bf16.vlgmr.msra.gmra.mrb[0].mxu0 %vm112_vm0, %v271_v45 }
  0x33   :  { %369 = vmatprep.mubr.bf16.mxu0 %v1240_v1  ;;  %1085 = vmatpush3.bf16.msra.mxu0 %v1210_v47 }
  0x3a   :  { %1015 = vmatmul.mubr.msk.bf16.gmra.mrb[4].mxu0 %vm112_vm0, %v272_v50  ;;  %v1212_v50 = vld [vmem:[%s1596_s2 + $0x48] sm:$0xff]  }
  0x3b   :  { %1086 = vmatprep.subr.bf16.mxu0 %v1212_v50 }
  0x3c   :  { %1087 = vmatpush3.bf16.msra.mxu0 %v1212_v50 }
 0x105   :  { %v1375_v51 = vpop.f32.mrb[0].mxu0 }
 0x106   :  { %v1377_v52 = vpop.f32.mrb[1].mxu0  ;;  %v399_v54 = vmul.f32 %v1375_v51, %v1375_v51 }
 0x107   :  { %v1379_v53 = vpop.f32.mrb[2].mxu0  ;;  %v470_v58 = vmul.f32 %v1377_v52, %v1377_v52 }
 0x108   :  { %v390_v55 = vadd.f32 %v1379_v53, %v1375_v51  ;;  %v400_v56 = vmul.f32 %v1379_v53, %v1379_v53  ;;  %v1387_v57 = vpop.f32.mrb[3].mxu0 }
 0x109   :  { %v461_v59 = vadd.f32 %v1387_v57, %v1377_v52  ;;  %v471_v60 = vmul.f32 %v1387_v57, %v1387_v57 }
 0x10a   :  { %v403_v61 = vadd.f32 %v400_v56, %v399_v54 }
 0x10b   :  { %v474_v62 = vadd.f32 %v471_v60, %v470_v58  ;;  %v1214_v58 = vld [vmem:[%s1596_s2 + $0x50] sm:$0xff]  }
 0x10c   :  { %1088 = vmatprep.subr.bf16.mxu0 %v1214_v58  ;;  %v1215_v60 = vld [vmem:[%s1596_s2 + $0x10] sm:$0xff]  }
 0x10d   :  { %v1395_v63 = vpop.f32.mrb[4].mxu0  ;;  %1089 = vmatpush3.bf16.msra.mxu0 %v1214_v58 }
 0x10e   :  { %v391_v0 = vadd.f32 %v390_v55, %v1395_v63  ;;  %v401_v1 = vmul.f32 %v1395_v63, %v1395_v63  ;;  %v1400_v2 = vpop.f32.mrb[5].mxu0  ;;  %v1213_v55 = vld [vmem:[%s1596_s2 + $0x8] sm:$0xff]  }
 0x10f   :  { %v462_v3 = vadd.f32 %v461_v59, %v1400_v2  ;;  %v472_v4 = vmul.f32 %v1400_v2, %v1400_v2  ;;  %v1405_v5 = vpop.f32.mrb[6].mxu0  ;;  %1106 = vmatprep.subr.bf16.mxu1 %v1213_v55 }
 0x110   :  { %v404_v6 = vadd.f32 %v403_v61, %v401_v1  ;;  %v392_v7 = vadd.f32 %v391_v0, %v1405_v5  ;;  %v402_v8 = vmul.f32 %v1405_v5, %v1405_v5  ;;  %v1410_v9 = vpop.f32.mrb[7].mxu0  ;;  %1107 = vmatpush3.bf16.msra.mxu1 %v1213_v55  ;;  %v1216_v61 = vld [vmem:[%s1596_s2 + $0x58] sm:$0xff]   ;;  %v1218_v0 = vld [vmem:[%s1596_s2 + $0x60] sm:$0xff]  }
 0x111   :  { %v475_v10 = vadd.f32 %v474_v62, %v472_v4  ;;  %v463_v11 = vadd.f32 %v462_v3, %v1410_v9  ;;  %v473_v12 = vmul.f32 %v1410_v9, %v1410_v9  ;;  %1108 = vmatprep.subr.bf16.mxu1 %v1215_v60  ;;  %1090 = vmatprep.subr.bf16.mxu0 %v1216_v61  ;;  %v1217_v62 = vld [vmem:[%s1596_s2 + $0x18] sm:$0xff]   ;;  %v1219_v1 = vld [vmem:[%s1596_s2 + $0x20] sm:$0xff]   ;;  %v1220_v3 = vld [vmem:[%s1596_s2 + $0x68] sm:$0xff]  }
 0x112   :  { %v393_v13 = vrot.slane %v392_v7, 4  ;;  %v405_v14 = vadd.f32 %v404_v6, %v402_v8  ;;  %1091 = vmatpush3.bf16.msra.mxu0 %v1216_v61  ;;  %v1221_v4 = vld [vmem:[%s1596_s2 + $0x28] sm:$0xff]   ;;  %v1222_v6 = vld [vmem:[%s1596_s2 + $0x70] sm:$0xff]   ;;  %v1224_v8 = vld [vmem:[%s1596_s2 + $0x78] sm:$0xff]  }
 0x113   :  { %v464_v15 = vrot.slane %v463_v11, 4  ;;  %v476_v16 = vadd.f32 %v475_v10, %v473_v12  ;;  %1092 = vmatprep.subr.bf16.mxu0 %v1218_v0  ;;  %v1225_v10 = vld [vmem:[%s1596_s2 + $0x38] sm:$0xff]  }
 0x114   :  { %v394_v17 = vadd.f32 %v393_v13, %v392_v7  ;;  %v406_v18 = vrot.slane %v405_v14, 4  ;;  %1109 = vmatpush3.bf16.msra.mxu1 %v1215_v60  ;;  %v1223_v7 = vld [vmem:[%s1596_s2 + $0x30] sm:$0xff]  }
 0x115   :  { %v465_v19 = vadd.f32 %v464_v15, %v463_v11  ;;  %v477_v20 = vrot.slane %v476_v16, 4  ;;  %1110 = vmatprep.subr.bf16.mxu1 %v1217_v62  ;;  %v1475_v11 = vld [vmem:[%s1596_s2 + $0x80] sm:$0xff]  }
 0x116   :  { %v395_v21 = vrot.slane %v394_v17, 2  ;;  %v407_v22 = vadd.f32 %v406_v18, %v405_v14  ;;  %1093 = vmatpush3.bf16.msra.mxu0 %v1218_v0 }
 0x117   :  { %v466_v23 = vrot.slane %v465_v19, 2  ;;  %v478_v24 = vadd.f32 %v477_v20, %v476_v16  ;;  %1094 = vmatprep.subr.bf16.mxu0 %v1220_v3 }
 0x118   :  { %v396_v25 = vadd.f32 %v395_v21, %v394_v17  ;;  %v408_v26 = vrot.slane %v407_v22, 2  ;;  %1111 = vmatpush3.bf16.msra.mxu1 %v1217_v62  ;;  %v437_v21 = vlaneseq  ;;  %v1227_v62 = vld [vmem:[%s1596_s2 + $0x88] sm:$0xff]  }
 0x119   :  { %v467_v27 = vadd.f32 %v466_v23, %v465_v19  ;;  %v479_v28 = vrot.slane %v478_v24, 2  ;;  %1112 = vmatprep.subr.bf16.mxu1 %v1219_v1 }
 0x11a   :  { %v397_v29 = vrot.slane %v396_v25, 1  ;;  %v409_v30 = vadd.f32 %v408_v26, %v407_v22  ;;  %1095 = vmatpush3.bf16.msra.mxu0 %v1220_v3  ;;  %v438_v22 = vshrl.u32 %v437_v21, 7  ;;  %v1228_v3 = vld [vmem:[%s1596_s2 + $0x90] sm:$0xff]  }
 0x11b   :  { %v468_v31 = vrot.slane %v467_v27, 1  ;;  %v480_v32 = vadd.f32 %v479_v28, %v478_v24  ;;  %1096 = vmatprep.subr.bf16.mxu0 %v1222_v6  ;;  %v388_v24 = vld [vmem:[%s1597_s3] sm:$0x1]  ;;  %v389_v28 = vld [vmem:[%s1597_s3 + $0x1] sm:$0x1] }
 0x11c   :  { %v410_v33 = vrot.slane %v409_v30, 1  ;;  %v398_v35 = vadd.f32 %v397_v29, %v396_v25  ;;  %1113 = vmatpush3.bf16.msra.mxu1 %v1219_v1  ;;  %v1485_v25 = vsub.s32 0, %v438_v22 }
 0x11d   :  { %v481_v34 = vrot.slane %v480_v32, 1  ;;  %v469_v37 = vadd.f32 %v468_v31, %v467_v27  ;;  %1114 = vmatprep.subr.bf16.mxu1 %v1221_v4 }
 0x11e   :  { %v411_v36 = vadd.f32 %v410_v33, %v409_v30  ;;  %1097 = vmatpush3.bf16.msra.mxu0 %v1222_v6  ;;  %v1230_v6 = vld [vmem:[%s1596_s2 + $0xa0] sm:$0xff]  }
 0x11f   :  { %v482_v38 = vadd.f32 %v481_v34, %v480_v32  ;;  %1098 = vmatprep.subr.bf16.mxu0 %v1224_v8 }
 0x120   :  { %v412_v39 = vsel %vm26_vm1, %v398_v35, %v411_v36  ;;  %1115 = vmatpush3.bf16.msra.mxu1 %v1221_v4  ;;  %v1229_v4 = vld [vmem:[%s1596_s2 + $0x98] sm:$0xff]  }
 0x121   :  { %413 = vrot.lane.b32.xlu0 %v412_v39, %s1241_s1  ;;  %v483_v40 = vsel %vm26_vm1, %v469_v37, %v482_v38  ;;  %1116 = vmatprep.subr.bf16.mxu1 %v1223_v7 }
 0x122   :  { %1099 = vmatpush3.bf16.msra.mxu0 %v1224_v8  ;;  %v1232_v8 = vld [vmem:[%s1596_s2 + $0xb0] sm:$0xff]  }
 0x124   :  { %1117 = vmatpush3.bf16.msra.mxu1 %v1223_v7  ;;  %v1231_v7 = vld [vmem:[%s1596_s2 + $0xa8] sm:$0xff]  }
 0x125   :  { %1118 = vmatprep.subr.bf16.mxu1 %v1225_v10 }
 0x128   :  { %1119 = vmatpush3.bf16.msra.mxu1 %v1225_v10  ;;  %v1233_v10 = vld [vmem:[%s1596_s2 + $0xb8] sm:$0xff]  }
 0x129   :  { %1124 = vmatprep.subr.bf16.mxu1 %v1475_v11 }
 0x193   :  { %v414_v41 = vpop.permute.xlu0 %413 }
 0x194   :  { %v415_v42 = vadd.f32 %v414_v41, %v412_v39 }
 0x196   :  { %416 = vrot.lane.b32.xlu0 %v415_v42, %s1242_s18 }
 0x19a   :  { %484 = vrot.lane.b32.xlu0 %v483_v40, %s1241_s1 }
 0x208   :  { %v417_v43 = vpop.permute.xlu0 %416 }
 0x209   :  { %v418_v44 = vadd.f32 %v417_v43, %v415_v42 }
 0x20b   :  { %419 = vrot.lane.b32.xlu1 %v418_v44, %s1243_s19 }
 0x20c   :  { %v485_v45 = vpop.permute.xlu0 %484 }
 0x20d   :  { %v486_v46 = vadd.f32 %v485_v45, %v483_v40 }
 0x20f   :  { %487 = vrot.lane.b32.xlu0 %v486_v46, %s1242_s18 }
 0x27d   :  { %v420_v49 = vpop.permute.xlu1 %419 }
 0x27e   :  { %v421_v54 = vadd.f32 %v420_v49, %v418_v44 }
 0x280   :  { %422 = vrot.lane.b32.xlu1 %v421_v54, %s1244_s27 }
 0x281   :  { %v488_v56 = vpop.permute.xlu0 %487 }
 0x282   :  { %v489_v59 = vadd.f32 %v488_v56, %v486_v46 }
 0x284   :  { %490 = vrot.lane.b32.xlu0 %v489_v59, %s1243_s19 }
 0x2f2   :  { %v423_v12 = vpop.permute.xlu1 %422 }
 0x2f3   :  { %v424_v13 = vadd.f32 %v423_v12, %v421_v54 }
 0x2f5   :  { %v425_v14 = vmul.f32 0.001953125, %v424_v13 }
 0x2f6   :  { %v491_v15 = vpop.permute.xlu0 %490 }
 0x2f7   :  { %v426_v16 = vmul.f32 %v425_v14, %v425_v14  ;;  %v1478_v17 = vadd.f32 %v491_v15, %v489_v59 }
 0x2f9   :  { %v428_v18 = vrot.slane %v426_v16, 7  ;;  %493 = vrot.lane.b32.xlu0 %v1478_v17, %s1244_s27 }
 0x2fb   :  { %v430_v19 = vsub.f32 %v425_v14, %v428_v18 }
 0x2fd   :  { %v431_v20 = vadd.f32 1e-05, %v430_v19 }
 0x2ff   :  { %1234 = vrsqrt.f32 %v431_v20 }
 0x309   :  { %v1235_v23 = vpop.eup %1234 }
 0x30a   :  { %v434_v26 = vrot.slane %v1235_v23, 1 }
 0x30c   :  { %v436_v27 = vmul.f32 %v434_v26, %v388_v24 }
 0x30e   :  { %v440_v29 = vrot.slane %v436_v27, %v1485_v25  ;;  %v445_v30 = vmul.f32 %v436_v27, %v425_v14 }
 0x310   :  { %v446_v31 = vsub.f32 %v389_v28, %v445_v30  ;;  %v443_v32 = vmul.f32 %v440_v29, %v1395_v63  ;;  %v444_v33 = vmul.f32 %v440_v29, %v1405_v5  ;;  %v441_v35 = vmul.f32 %v440_v29, %v1375_v51 }
 0x311   :  { %v442_v36 = vmul.f32 %v440_v29, %v1379_v53 }
 0x312   :  { %v450_v34 = vrot.slane %v446_v31, %v1485_v25 }
 0x314   :  { %v451_v37 = vadd.f32 %v450_v34, %v441_v35  ;;  %v452_v38 = vadd.f32 %v450_v34, %v442_v36  ;;  %v453_v39 = vadd.f32 %v450_v34, %v443_v32  ;;  %v454_v40 = vadd.f32 %v450_v34, %v444_v33 }
 0x316   :  { %v455_v41 = vmax.f32 %v451_v37, 0.0  ;;  %v456_v42 = vmax.f32 %v452_v38, 0.0  ;;  %v457_v43 = vmax.f32 %v453_v39, 0.0  ;;  %v458_v44 = vmax.f32 %v454_v40, 0.0 }
 0x318   :  { %v572_v45 = vpack.c.bf16 %v456_v42, %v455_v41  ;;  %v573_v63 = vpack.c.bf16 %v458_v44, %v457_v43  ;;  %v530_v46 = vrot.slane %v455_v41, 7  ;;  %v531_v5 = vrot.slane %v456_v42, 7 }
 0x319   :  { %v533_v47 = vrot.slane %v457_v43, 7  ;;  %v534_v48 = vrot.slane %v458_v44, 7  ;;  %v542_v49 = vrot.slane %v455_v41, 1  ;;  %v543_v51 = vrot.slane %v456_v42, 1 }
 0x31a   :  { %1100 = vmatprep.mubr.bf16.mxu0 %v572_v45  ;;  %v532_v53 = vsel %vm26_vm1, %v530_v46, %v531_v5  ;;  %v545_v50 = vrot.slane %v457_v43, 1  ;;  %v546_v54 = vrot.slane %v458_v44, 1 }
 0x31b   :  { %1101 = vmatmul.mubr.bf16.vlgmr.msra.gmra.mrb[8].mxu0 %v573_v63  ;;  %v1034_v55 = vpack.c.bf16 %v532_v53, %v530_v46  ;;  %v535_v56 = vsel %vm26_vm1, %v533_v47, %v534_v48  ;;  %v544_v58 = vsel %vm39_vm2, %v542_v49, %v543_v51 }
 0x31c   :  { %v1038_v60 = vpack.c.bf16 %v535_v56, %v533_v47  ;;  %v1049_v61 = vpack.c.bf16 %v543_v51, %v544_v58  ;;  %v547_v0 = vsel %vm39_vm2, %v545_v50, %v546_v54 }
 0x31d   :  { %1120 = vmatprep.mubr.msk.bf16.mxu1 %vm1033_vm5, %v1034_v55  ;;  %v1052_v1 = vpack.c.bf16 %v546_v54, %v547_v0 }
 0x31e   :  { %1121 = vmatmul.mubr.msk.bf16.vlgmr.msra.gmra.mrb[0].mxu1 %vm1033_vm5, %v1038_v60 }
 0x31f   :  { %1125 = vmatpush3.bf16.msra.mxu1 %v1475_v11  ;;  %1140 = vmatprep.mubr.msk.bf16.mxu1 %vm1501_vm6, %v1049_v61 }
 0x320   :  { %1126 = vmatprep.subr.bf16.mxu1 %v1227_v62 }
 0x323   :  { %1127 = vmatpush3.bf16.msra.mxu1 %v1227_v62 }
 0x324   :  { %1128 = vmatprep.subr.bf16.mxu1 %v1228_v3 }
 0x327   :  { %1129 = vmatpush3.bf16.msra.mxu1 %v1228_v3 }
 0x328   :  { %1130 = vmatprep.subr.bf16.mxu1 %v1229_v4 }
 0x32b   :  { %1131 = vmatpush3.bf16.msra.mxu1 %v1229_v4 }
 0x32c   :  { %1132 = vmatprep.subr.bf16.mxu1 %v1230_v6 }
 0x32f   :  { %1133 = vmatpush3.bf16.msra.mxu1 %v1230_v6 }
 0x330   :  { %1134 = vmatprep.subr.bf16.mxu1 %v1231_v7 }
 0x333   :  { %1135 = vmatpush3.bf16.msra.mxu1 %v1231_v7 }
 0x334   :  { %1136 = vmatprep.subr.bf16.mxu1 %v1232_v8 }
 0x337   :  { %1137 = vmatpush3.bf16.msra.mxu1 %v1232_v8 }
 0x338   :  { %1138 = vmatprep.subr.bf16.mxu1 %v1233_v10 }
 0x33b   :  { %1139 = vmatpush3.bf16.msra.mxu1 %v1233_v10 }
 0x33e   :  { %1141 = vmatmul.mubr.msk.bf16.vlgmr.msra.gmra.mrb[0].mxu1 %vm1501_vm6, %v1052_v1 }
 0x36b   :  { %v494_v50 = vpop.permute.xlu0 %493 }
 0x36c   :  { %v495_v54 = vadd.f32 %v494_v50, %v1478_v17  ;;  %v459_v17 = vld [vmem:[%s1597_s3 + $0x4] sm:$0x1] }
 0x36e   :  { %v496_v55 = vmul.f32 0.001953125, %v495_v54 }
 0x370   :  { %v497_v56 = vmul.f32 %v496_v55, %v496_v55 }
 0x372   :  { %v499_v58 = vrot.slane %v497_v56, 7 }
 0x374   :  { %v501_v59 = vsub.f32 %v496_v55, %v499_v58 }
 0x376   :  { %v502_v60 = vadd.f32 1e-05, %v501_v59 }
 0x378   :  { %1236 = vrsqrt.f32 %v502_v60 }
 0x382   :  { %v1237_v6 = vpop.eup %1236 }
 0x383   :  { %v505_v8 = vrot.slane %v1237_v6, 1 }
 0x385   :  { %v507_v10 = vmul.f32 %v505_v8, %v459_v17 }
 0x3ee   :  { %v1102_v11 = vpop.f32.mrb[8].mxu0 }
 0x3ef   :  { %v672_v12 = vpop.f32.mrb[9].mxu0 }
 0x3f0   :  { %v1103_v13 = vpop.f32.mrb[10].mxu0 }
 0x3f1   :  { %v675_v14 = vpop.f32.mrb[11].mxu0 }
 0x411   :  { %v1142_v15 = vpop.f32.mrb[0].mxu1 }
 0x412   :  { %v1532_v16 = vadd.f32 %v1142_v15, %v1102_v11  ;;  %v884_v18 = vpop.f32.mrb[1].mxu1  ;;  %v516_v11 = vmul.f32 %v507_v10, %v496_v55 }
 0x413   :  { %v1534_v19 = vadd.f32 %v884_v18, %v672_v12  ;;  %v1143_v20 = vpop.f32.mrb[2].mxu1 }
 0x414   :  { %v1536_v21 = vadd.f32 %v1143_v20, %v1103_v13  ;;  %v887_v22 = vpop.f32.mrb[3].mxu1  ;;  %v916_v28 = vmul.f32 %v1532_v16, %v1532_v16  ;;  %v460_v13 = vld [vmem:[%s1597_s3 + $0x5] sm:$0x1] }
 0x415   :  { %v1538_v23 = vadd.f32 %v887_v22, %v675_v14  ;;  %v914_v24 = vmul.f32 %v1534_v19, %v1534_v19  ;;  %v903_v14 = vld [vmem:[%s1597_s3 + $0x2] sm:$0x1]  ;;  %v517_v18 = vsub.f32 %v460_v13, %v516_v11  ;;  %v511_v22 = vrot.slane %v507_v10, %v1485_v25 }
 0x416   :  { %v917_v31 = vmul.f32 %v1536_v21, %v1536_v21 }
 0x417   :  { %v905_v26 = vadd.f32 %v1538_v23, %v1534_v19  ;;  %v915_v27 = vmul.f32 %v1538_v23, %v1538_v23 }
 0x419   :  { %v906_v29 = vadd.f32 %v1532_v16, %v905_v26  ;;  %v918_v30 = vadd.f32 %v915_v27, %v914_v24  ;;  %v904_v24 = vld [vmem:[%s1597_s3 + $0x3] sm:$0x1] }
 0x41b   :  { %v907_v32 = vadd.f32 %v1536_v21, %v906_v29  ;;  %v919_v33 = vadd.f32 %v918_v30, %v916_v28  ;;  %v521_v28 = vrot.slane %v517_v18, %v1485_v25  ;;  %v512_v29 = vmul.f32 %v511_v22, %v1377_v52 }
 0x41d   :  { %v908_v34 = vrot.slane %v907_v32, 4  ;;  %v920_v35 = vadd.f32 %v919_v33, %v917_v31  ;;  %v513_v31 = vmul.f32 %v511_v22, %v1387_v57  ;;  %v515_v33 = vmul.f32 %v511_v22, %v1410_v9 }
 0x41f   :  { %v909_v36 = vadd.f32 %v908_v34, %v907_v32  ;;  %v921_v37 = vrot.slane %v920_v35, 4  ;;  %v514_v32 = vmul.f32 %v511_v22, %v1400_v2 }
 0x421   :  { %v910_v38 = vrot.slane %v909_v36, 2  ;;  %v922_v39 = vadd.f32 %v921_v37, %v920_v35  ;;  %v524_v52 = vadd.f32 %v521_v28, %v514_v32 }
 0x423   :  { %v911_v40 = vadd.f32 %v910_v38, %v909_v36  ;;  %v923_v41 = vrot.slane %v922_v39, 2 }
 0x425   :  { %v912_v42 = vrot.slane %v911_v40, 1  ;;  %v924_v43 = vadd.f32 %v923_v41, %v922_v39  ;;  %v522_v39 = vadd.f32 %v521_v28, %v512_v29  ;;  %v525_v41 = vadd.f32 %v521_v28, %v515_v33 }
 0x427   :  { %v925_v44 = vrot.slane %v924_v43, 1  ;;  %v913_v45 = vadd.f32 %v912_v42, %v911_v40  ;;  %v523_v40 = vadd.f32 %v521_v28, %v513_v31 }
 0x429   :  { %v926_v63 = vadd.f32 %v925_v44, %v924_v43 }
 0x42b   :  { %v927_v46 = vsel %vm26_vm1, %v913_v45, %v926_v63 }
 0x42c   :  { %928 = vrot.lane.b32.xlu1 %v927_v46, %s1241_s1 }
 0x49e   :  { %v929_v5 = vpop.permute.xlu1 %928 }
 0x49f   :  { %v930_v47 = vadd.f32 %v929_v5, %v927_v46 }
 0x4a1   :  { %931 = vrot.lane.b32.xlu1 %v930_v47, %s1242_s18 }
 0x513   :  { %v932_v48 = vpop.permute.xlu1 %931 }
 0x514   :  { %v933_v49 = vadd.f32 %v932_v48, %v930_v47 }
 0x516   :  { %934 = vrot.lane.b32.xlu1 %v933_v49, %s1243_s19 }
 0x588   :  { %v935_v51 = vpop.permute.xlu1 %934 }
 0x589   :  { %v936_v53 = vadd.f32 %v935_v51, %v933_v49 }
 0x58b   :  { %937 = vrot.lane.b32.xlu1 %v936_v53, %s1244_s27 }
 0x5fd   :  { %v938_v61 = vpop.permute.xlu1 %937 }
 0x5fe   :  { %v939_v62 = vadd.f32 %v938_v61, %v936_v53 }
 0x600   :  { %v940_v0 = vmul.f32 0.001953125, %v939_v62 }
 0x602   :  { %v941_v1 = vmul.f32 %v940_v0, %v940_v0 }
 0x604   :  { %v943_v3 = vrot.slane %v941_v1, 7 }
 0x606   :  { %v945_v4 = vsub.f32 %v940_v0, %v943_v3 }
 0x608   :  { %v946_v7 = vadd.f32 1e-05, %v945_v4 }
 0x60a   :  { %1238 = vrsqrt.f32 %v946_v7 }
 0x614   :  { %v1239_v12 = vpop.eup %1238 }
 0x615   :  { %v949_v15 = vrot.slane %v1239_v12, 1 }
 0x617   :  { %v951_v20 = vmul.f32 %v949_v15, %v903_v14 }
 0x619   :  { %v955_v26 = vrot.slane %v951_v20, %v1485_v25  ;;  %v960_v27 = vmul.f32 %v951_v20, %v940_v0 }
 0x61b   :  { %v961_v30 = vsub.f32 %v904_v24, %v960_v27  ;;  %v956_v34 = vmul.f32 %v1534_v19, %v955_v26  ;;  %v957_v35 = vmul.f32 %v1538_v23, %v955_v26  ;;  %v958_v36 = vmul.f32 %v1532_v16, %v955_v26 }
 0x61c   :  { %v959_v37 = vmul.f32 %v1536_v21, %v955_v26 }
 0x61d   :  { %v965_v38 = vrot.slane %v961_v30, %v1485_v25 }
 0x61f   :  { %v966_v42 = vadd.f32 %v965_v38, %v956_v34  ;;  %v967_v57 = vadd.f32 %v965_v38, %v957_v35  ;;  %v968_v43 = vadd.f32 %v965_v38, %v958_v36  ;;  %v969_v2 = vadd.f32 %v965_v38, %v959_v37 }
 0x621   :  { %v970_v44 = vadd.f32 %v966_v42, %v522_v39  ;;  %v971_v9 = vadd.f32 %v967_v57, %v523_v40  ;;  %v972_v45 = vadd.f32 %v968_v43, %v524_v52  ;;  %v973_v19 = vadd.f32 %v969_v2, %v525_v41 }
 0x623   :  { %v974_v63 = vmax.f32 %v970_v44, 0.0  ;;  %v975_v23 = vmax.f32 %v971_v9, 0.0  ;;  %v976_v46 = vmax.f32 %v972_v45, 0.0  ;;  %v977_v16 = vmax.f32 %v973_v19, 0.0 }
 0x625   :  { %978 = vst [vmem:[%s1598_s4] sm:$0xff] %v974_v63  ;;  %979 = vst [vmem:[%s1598_s4 + $0x8] sm:$0xff] %v975_v23 }
 0x626   :  { %980 = vst [vmem:[%s1598_s4 + $0x10] sm:$0xff] %v976_v46  ;;  %981 = vst [vmem:[%s1598_s4 + $0x18] sm:$0xff] %v977_v16 }

</bundles_post_ra>
